<compile_context>
chip_gen: v5e
topology: v5e:2x2
jax: 0.10.0
libtpu: 0.0.40
codegen_flags: <defaults>
</compile_context>

<pallas_src>
import jax
import jax.numpy as jnp
from jax.experimental import pallas as pl
from jax.experimental.pallas import tpu as pltpu


def _tensor_product_kernel(x_ref, w1t_ref, w2_ref, c_ref, o_ref):
    block_b, n2, n1 = x_ref.shape

    # map1 on the last dim as ONE big MXU matmul: (block_b*n2, n1) @ (n1, n1).
    x2 = x_ref[...].reshape(block_b * n2, n1)
    tmp = jnp.dot(x2, w1t_ref[...], preferred_element_type=jnp.float32)

    # map2 on dim -2 as a single batched matmul over the batch tile.
    tmp3 = tmp.reshape(block_b, n2, n1).astype(x_ref.dtype)
    w2b = jnp.broadcast_to(w2_ref[...], (block_b, n2, n2))
    out = jnp.einsum("bip,bpj->bij", w2b, tmp3,
                     preferred_element_type=jnp.float32)

    # Fused bias (f32, precomputed in the wrapper); broadcasts over the tile.
    out = out + c_ref[...]
    o_ref[...] = out.astype(o_ref.dtype)


def _choose_block_b(B, n2, target_rows=256):
    """Largest divisor of B keeping block_b*n2 near an MXU-friendly M dim while
    leaving >= 2 grid steps when possible (so both v7x TensorCores get work)."""
    divisors = [d for d in range(1, B + 1) if B % d == 0]
    candidates = [d for d in divisors if d * n2 <= target_rows] or [1]
    multi_step = [d for d in candidates if B // d >= 2]
    return max(multi_step) if multi_step else max(candidates)


def tensor_product(x, w1, b1, w2, b2, *, block_b=None, compute_dtype=None):
    """x: (B, n2, n1). W1: (n1, n1), b1: (n1,), W2: (n2, n2), b2: (n2,).
    Returns (B, n2, n1) in x.dtype."""
    B, n2, n1 = x.shape
    if block_b is None:
        block_b = _choose_block_b(B, n2)
    assert B % block_b == 0, "batch must be divisible by block_b"

    # Hoisted, loop-invariant prep (one-time XLA ops, not per grid step):
    w1t = jnp.swapaxes(w1, 0, 1)                                  # W1^T: (n1_in, n1_out)
    c = w2.sum(axis=1)[:, None] * b1[None, :] + b2[:, None]       # fused bias (n2, n1)
    c = c.astype(jnp.float32)

    if compute_dtype is not None:  # e.g. bf16 on v6e/v7x; accumulation stays f32
        x_in = x.astype(compute_dtype)
        w1t = w1t.astype(compute_dtype)
        w2_in = w2.astype(compute_dtype)
    else:
        x_in, w2_in = x, w2

    grid = (B // block_b,)
    return pl.pallas_call(
        _tensor_product_kernel,
        out_shape=jax.ShapeDtypeStruct((B, n2, n1), x.dtype),
        grid_spec=pltpu.PrefetchScalarGridSpec(
            num_scalar_prefetch=0,
            grid=grid,
            in_specs=[
                pl.BlockSpec((block_b, n2, n1), lambda b: (b, 0, 0)),  # x tile
                pl.BlockSpec((n1, n1), lambda b: (0, 0)),              # W1^T (loop-invariant)
                pl.BlockSpec((n2, n2), lambda b: (0, 0)),              # W2   (loop-invariant)
                pl.BlockSpec((n2, n1), lambda b: (0, 0)),              # fused bias C
            ],
            out_specs=pl.BlockSpec((block_b, n2, n1), lambda b: (b, 0, 0)),
        ),
        compiler_params=pltpu.CompilerParams(
            dimension_semantics=("parallel",),
            vmem_limit_bytes=32 * 1024 * 1024,
        ),
    )(x_in, w1t, w2_in, c)


def tensor_product_ref(x, w1, b1, w2, b2):
    # Pure-JAX reference mirroring the PyTorch forward exactly.
    out = jnp.einsum("bpq,jq->bpj", x, w1) + b1              # map1 on last dim
    out_t = jnp.swapaxes(out, -1, -2)                        # (*, n1, n2)
    out_t = jnp.einsum("bjp,ip->bji", out_t, w2) + b2        # map2 on (new) last dim
    return jnp.swapaxes(out_t, -1, -2)                       # (*, n2, n1)


if __name__ == "__main__":
    key = jax.random.PRNGKey(0)
    B, n2, n1 = 8, 16, 32

    kx, kw1, kb1, kw2, kb2 = jax.random.split(key, 5)
    x = jax.random.normal(kx, (B, n2, n1), dtype=jnp.float32)
    # Deterministic parameters (shapes from nn.Linear(n1, n1) / nn.Linear(n2, n2)).
    w1 = jax.random.normal(kw1, (n1, n1), dtype=jnp.float32) * 0.1
    b1 = jax.random.normal(kb1, (n1,), dtype=jnp.float32) * 0.1
    w2 = jax.random.normal(kw2, (n2, n2), dtype=jnp.float32) * 0.1
    b2 = jax.random.normal(kb2, (n2,), dtype=jnp.float32) * 0.1

    ref = tensor_product_ref(x, w1, b1, w2, b2)

    # f32 path: exact match against the reference.
    out = jax.block_until_ready(tensor_product(x, w1, b1, w2, b2))
    assert out.shape == (B, n2, n1)
    assert jnp.allclose(out, ref, atol=1e-5, rtol=1e-5)

    # bf16 compute path (MXU-native on v6e/v7x; f32 accumulation), loose check.
    out_bf16 = jax.block_until_ready(
        tensor_product(x, w1, b1, w2, b2, compute_dtype=jnp.bfloat16))
    assert jnp.allclose(out_bf16, ref, atol=5e-2, rtol=5e-2)

    print("KERNEL_OK")
</pallas_src>

<mosaic_0001>
module attributes {stable_mosaic.version = 11 : i64} {
  func.func @_tensor_product_kernel(%arg0: i32, %arg1: memref<4x16x32xf32, #tpu.memory_space<vmem>>, %arg2: memref<32x32xf32, #tpu.memory_space<vmem>>, %arg3: memref<16x16xf32, #tpu.memory_space<vmem>>, %arg4: memref<16x32xf32, #tpu.memory_space<vmem>>, %arg5: memref<4x16x32xf32, #tpu.memory_space<vmem>>) attributes {dimension_semantics = [#tpu.dimension_semantics<parallel>], iteration_bounds = array<i64: 2>, scalar_prefetch = 0 : i64, scratch_operands = 0 : i64, tpu.core_type = #tpu.core_type<tc>, window_params = [{transform_indices = @transform_0, window_bounds = array<i64: 4, 16, 32>}, {pipeline_mode = #tpu.pipeline_mode<synchronous>, transform_indices = @transform_1, window_bounds = array<i64: 32, 32>}, {pipeline_mode = #tpu.pipeline_mode<synchronous>, transform_indices = @transform_2, window_bounds = array<i64: 16, 16>}, {pipeline_mode = #tpu.pipeline_mode<synchronous>, transform_indices = @transform_3, window_bounds = array<i64: 16, 32>}, {transform_indices = @transform_4, window_bounds = array<i64: 4, 16, 32>}]} {
    %c0 = arith.constant 0 : index
    %c0_0 = arith.constant 0 : index
    %c0_1 = arith.constant 0 : index
    %0 = vector.load %arg1[%c0, %c0_0, %c0_1] : memref<4x16x32xf32, #tpu.memory_space<vmem>>, vector<4x16x32xf32>
    %1 = vector.shape_cast %0 : vector<4x16x32xf32> to vector<64x32xf32>
    %c0_2 = arith.constant 0 : index
    %c0_3 = arith.constant 0 : index
    %2 = vector.load %arg2[%c0_2, %c0_3] : memref<32x32xf32, #tpu.memory_space<vmem>>, vector<32x32xf32>
    %cst = arith.constant dense<0.000000e+00> : vector<64x32xf32>
    %3 = tpu.matmul %1, %2, %cst {dimension_numbers = #tpu.dot_dimension_numbers<[1], [0], [0], [1], [0, 0, 1, 1], [], []>} : vector<64x32xf32>, vector<32x32xf32>, vector<64x32xf32> -> vector<64x32xf32>
    %4 = vector.shape_cast %3 : vector<64x32xf32> to vector<4x16x32xf32>
    %c0_4 = arith.constant 0 : index
    %c0_5 = arith.constant 0 : index
    %5 = vector.load %arg3[%c0_4, %c0_5] : memref<16x16xf32, #tpu.memory_space<vmem>>, vector<16x16xf32>
    %6 = vector.shape_cast %5 : vector<16x16xf32> to vector<1x16x16xf32>
    %7 = vector.broadcast %6 : vector<1x16x16xf32> to vector<4x16x16xf32>
    "tpu.trace_start"() <{level = 10 : i32, message = "bip,bpj->bij"}> : () -> ()
    %cst_6 = arith.constant dense<0.000000e+00> : vector<4x16x32xf32>
    %8 = tpu.matmul %7, %4, %cst_6 {dimension_numbers = #tpu.dot_dimension_numbers<[2], [1], [1], [2], [0, 0, 0, 1, 1, 2], [0], [0]>} : vector<4x16x16xf32>, vector<4x16x32xf32>, vector<4x16x32xf32> -> vector<4x16x32xf32>
    "tpu.trace_stop"() : () -> ()
    %c0_7 = arith.constant 0 : index
    %c0_8 = arith.constant 0 : index
    %9 = vector.load %arg4[%c0_7, %c0_8] : memref<16x32xf32, #tpu.memory_space<vmem>>, vector<16x32xf32>
    %10 = vector.shape_cast %9 : vector<16x32xf32> to vector<1x16x32xf32>
    %11 = vector.broadcast %10 : vector<1x16x32xf32> to vector<4x16x32xf32>
    %12 = arith.addf %8, %11 : vector<4x16x32xf32>
    %c0_9 = arith.constant 0 : index
    %c0_10 = arith.constant 0 : index
    %c0_11 = arith.constant 0 : index
    %13 = vector.load %arg5[%c0_9, %c0_10, %c0_11] : memref<4x16x32xf32, #tpu.memory_space<vmem>>, vector<4x16x32xf32>
    tpu.vector_store %arg5[%c0_9, %c0_10, %c0_11], %12 {strides = array<i32>} : memref<4x16x32xf32, #tpu.memory_space<vmem>>, vector<4x16x32xf32>,
    return
  }
  func.func @transform_0(%arg0: i32) -> (i32, i32, i32) {
    %c0_i32 = arith.constant 0 : i32
    %c0_i32_0 = arith.constant 0 : i32
    %c0_i32_1 = arith.constant 0 : i32
    return %arg0, %c0_i32, %c0_i32_0 : i32, i32, i32
  }
  func.func @transform_1(%arg0: i32) -> (i32, i32) {
    %c0_i32 = arith.constant 0 : i32
    %c0_i32_0 = arith.constant 0 : i32
    %c0_i32_1 = arith.constant 0 : i32
    return %c0_i32, %c0_i32_0 : i32, i32
  }
  func.func @transform_2(%arg0: i32) -> (i32, i32) {
    %c0_i32 = arith.constant 0 : i32
    %c0_i32_0 = arith.constant 0 : i32
    %c0_i32_1 = arith.constant 0 : i32
    return %c0_i32, %c0_i32_0 : i32, i32
  }
  func.func @transform_3(%arg0: i32) -> (i32, i32) {
    %c0_i32 = arith.constant 0 : i32
    %c0_i32_0 = arith.constant 0 : i32
    %c0_i32_1 = arith.constant 0 : i32
    return %c0_i32, %c0_i32_0 : i32, i32
  }
  func.func @transform_4(%arg0: i32) -> (i32, i32, i32) {
    %c0_i32 = arith.constant 0 : i32
    %c0_i32_0 = arith.constant 0 : i32
    %c0_i32_1 = arith.constant 0 : i32
    return %arg0, %c0_i32, %c0_i32_0 : i32, i32, i32
  }
}

</mosaic_0001>

<bundles_post_ra>
// kernel: tpu_custom_call.1
= control target key start
LH: loop header
LB: loop body
LE: loop exit
PB: predicated region body
PF: predicated region fallthrough
CT: control target
= control target key end

     0   :  { %9 = vsyncpa [#allocation3], 0  ;;  %s1146_s0 = inlined_call_operand.hbm [shape: f32[8,16,32], index: 0, kind: input, shape index: {}]   ;;  %s1147_s1 = inlined_call_operand.hbm [shape: f32[32,32], index: 1, kind: input, shape index: {}]   ;;  %s1148_s2 = inlined_call_operand.hbm [shape: f32[16,16], index: 2, kind: input, shape index: {}]   ;;  %s1149_s3 = inlined_call_operand.hbm [shape: f32[16,32], index: 3, kind: input, shape index: {}]   ;;  %s1150_s4 = inlined_call_operand.hbm [shape: f32[8,16,32], index: 4, kind: output, shape index: {}]  }
   0x1   :  { %11 = vsyncpa [#allocation3 + $0x1], 0 }
   0x2   :  { %12 = vsyncpa [#allocation6], 0 }
   0x3   :  { %13 = vsyncpa [#allocation9], 0 }
   0x4   :  { %14 = vsyncpa [#allocation4], 0 }
   0x5   :  { %16 = vsyncpa [#allocation4 + $0x1], 0  ;;  %s938_s15 = smov 0   ;;  %s940_s16 = smov 0  }
   0x6   :  { %s942_s17 = smov 0   ;;  %s944_s18 = smov 0  }
   0x7 LB: > { %s959_s19 = sadd.s32 4294967295, %s904_s18   ;;  %s579_s20 = sadd.s32 4294967294, %s904_s18   ;;  %s904_s18 = sphi %s944_s18, %s1161_s18   ;;  %s900_s17 = sphi %s942_s17, %s1160_s17   ;;  %s896_s16 = sphi %s940_s16, %s1159_s16   ;;  %s892_s15 = sphi %s938_s15, %s1158_s15  }
   0x8   : > { %p42_p0 = scmp.ne.s32.totalorder %s896_s16, %s892_s15  ;;  %p43_p1 = scmp.eq.s32.totalorder %s959_s19, 0 }
   0x9   : > { %p129_p2 = scmp.eq.s32.totalorder %s959_s19, 1  ;;  %p135_p3 = scmp.eq.s32.totalorder %s579_s20, 1 }
   0xa   : > { %p968_p4 = por %p43_p1, %p42_p0  ;;  %p580_p5 = scmp.ge.s32.totalorder %s904_s18, 1 }
   0xb   : > { %p973_p6 = por %p135_p3, %p42_p0  ;;  %p142_p7 = scmp.lt.s32.totalorder %s904_s18, 3 }
   0xc   : > { %s153_s25 = sshll.u32 %s1147_s1, 4  ;;  %s906_s27 = smov [#allocation5]   ;;  %s154_s25 = int_to_ptr.hbm [resolvable:$true] %s153_s25 }
   0xd   : > { %p981_p8 = pnand %p580_p5, %p142_p7  ;;  %s155_s28 = sshll.u32 %s906_s27, 4  ;;  %s156_s28 = int_to_ptr.vmem [resolvable:$true] %s155_s28 }
   0xe   : > { %s167_s6 = sshll.u32 %s1148_s2, 4  ;;  %s907_s7 = smov 128   ;;  %s168_s6 = int_to_ptr.hbm [resolvable:$true] %s167_s6 }
   0xf   : > { %p645_p9 = pneg %p981_p8  ;;  %s908_s8 = smov 8  }
  0x10   : > { %s909_s9 = smov [#allocation7]   ;;  %s181_s13 = sshll.u32 %s1149_s3, 4  ;;  %s182_s13 = int_to_ptr.hbm [resolvable:$true] %s181_s13 }
  0x11   : > { %p989_p10 = pnand %p645_p9, %p43_p1  ;;  %s169_s10 = sshll.u32 %s909_s9, 4  ;;  %s170_s10 = int_to_ptr.vmem [resolvable:$true] %s169_s10 }
  0x12   : > { %s910_s14 = smov [#allocation8]   ;;  %s1011_s23 = sadd.s32 1, %s904_s18  }
  0x13   : > { %648 = dma.hbm_to_vmem [thread:$0]  (!%p989_p10), %s154_s25, 512, %s156_s28, [#allocation6], %s907_s7, %s907_s7, %s908_s8  }
  0x14   : > { %651 = dma.hbm_to_vmem [thread:$0]  (!%p989_p10), %s168_s6, 256, %s170_s10, [#allocation6], %s907_s7, %s907_s7, %s908_s8  }
  0x15   : > { %s183_s20 = sshll.u32 %s910_s14, 4  ;;  %s26_s24 = ssub.s32 %s904_s18, %s1011_s23  ;;  %s184_s20 = int_to_ptr.vmem [resolvable:$true] %s183_s20 }
  0x16   : > { %654 = dma.hbm_to_vmem [thread:$0]  (!%p989_p10), %s182_s13, 256, %s184_s20, [#allocation9], %s907_s7, %s907_s7, %s908_s8  }
  0x17   : > { %s29_s25 = sadd.s32 1, %s900_s17  ;;  %p27_p12 = scmp.eq.s32.totalorder %s26_s24, 0 }
  0x18   : > { %p36_p13 = scmp.ne.s32.totalorder %s900_s17, %s896_s16  ;;  %p37_p0 = scmp.eq.s32.totalorder %s904_s18, 0 }
  0x19   : > { %s1025_s27 = scalar_select %p27_p12, %s900_s17, %s29_s25  }
  0x1a   : > { %p1029_p3 = por %p129_p2, %p36_p13  ;;  %p666_p5 = scmp.lt.s32.totalorder %s904_s18, 2 }
  0x1b   : > { %s197_s30 = sand.u32 1, %s900_s17   ;;  %s618_s29 = sshll.u32 %s904_s18, 6 }
  0x1c   : > { %p38_p7 = por %p37_p0, %p36_p13  ;;  %s585_s5 = sshll.u32 %s197_s30, 6 }
  0x1d   : > { %s207_s10 = scalar_lea.hbm %s1146_s0, %s618_s29  ;;  %s201_s12 = scalar_lea.vmem [#allocation2], %s585_s5 }
  0x1e   : > { %s208_s11 = sshll.u32 %s207_s10, 4  ;;  %s210_s13 = sshll.u32 %s201_s12, 4  ;;  %s209_s11 = int_to_ptr.hbm [resolvable:$true] %s208_s11  ;;  %s211_s13 = int_to_ptr.vmem [resolvable:$true] %s210_s13 }
  0x1f   : > { %p1039_p9 = pnand %p666_p5, %p38_p7  ;;  %s198_s20 = scalar_lea.sflag [#allocation3], %s197_s30 }
  0x20   : > { %s800_s24 = sshra.s32 %s209_s11, 4  ;;  %s807_s5 = scalar_lea.hbm %s1146_s0, 128  ;;  %s801_s24 = int_to_ptr.hbm [resolvable:$true] %s800_s24 }
  0x21   : > { %s802_s25 = scalar_lea.hbm %s801_s24, 64  ;;  %p804_p10 = pneg %p1039_p9 }
  0x22   : > { %p803_p2 = scmp.ne.s32.totalorder %s801_s24, %s802_s25  ;;  %p808_p0 = scmp.lt.s32.totalorder %s801_s24, %s1146_s0 }
  0x23   : > { %p809_p5 = scmp.lt.s32.totalorder %s807_s5, %s802_s25 }
  0x24   : > { %p805_p12 = pnand %p804_p10, %p803_p2 }
  0x25   : > { %p810_p7 = por %p809_p5, %p808_p0 }
  0x26   : > { %p806_p13 = pneg %p805_p12 }
  0x28   : > { %p811_p11 = pnand %p810_p7, %p806_p13 }
  0x2a   : > { %814 = shalt.err (!%p811_p11)
}
  0x2b   : > { %658 = dma.hbm_to_vmem [thread:$0]  (!%p1039_p9), %s209_s11, 1024, %s211_s13, %s198_s20, %s907_s7, %s907_s7, %s908_s8  }
  0x2c   : > { %222 = sbr.rel (%p981_p8) target bundleno = 361 (0x169), region = 36  ;;  %s1059_s30 = sand.u32 (!%p981_p8), 1, %s896_s16  }
  0x2d   : > { %s590_s12 = sshll.u32 (!%p981_p8), %s1059_s30, 6  ;;  %s225_s24 = scalar_lea.sflag (!%p981_p8), [#allocation3], %s1059_s30 }
  0x2e   : > { %s1065_s25 = scalar_lea.vmem (!%p981_p8), [#allocation2], %s590_s12 }
  0x31   : > { %875 = dma.done.wait (%p968_p4), %s225_s24, 1024  }
  0x32   : > { %877 = vsyncadd (%p968_p4), %s225_s24, 4294966272 }
  0x33   : > { %879 = dma.done.wait (%p43_p1), [#allocation6], 768  }
  0x34   : > { %881 = vsyncadd (%p43_p1), [#allocation6], 4294966528 }
  0x35   : > { %883 = dma.done.wait (%p43_p1), [#allocation9], 256  }
  0x36   : > { %885 = vsyncadd (%p43_p1), [#allocation9], 4294967040  ;;  %v282_v0 = vld [vmem:[#allocation5 + $0x18] sm:$0xff]  ;;  %v281_v1 = vld [vmem:[#allocation5 + $0x10] sm:$0xff]  ;;  %vm283_vm0 = vcmask 261120   ;;  %vm353_vm1 = vcmask 130048  }
  0x37   : > { %320 = vmatpush.msra.mxu0 %v282_v0  ;;  %621 = vmatpush.msra.mxu2 %v282_v0  ;;  %v280_v2 = vld [vmem:[#allocation5 + $0x8] sm:$0xff]  ;;  %v279_v3 = vld [vmem:[#allocation5] sm:$0xff]  ;;  %v277_v6 = vld [vmem:[%s1065_s25 + $0x30] sm:$0xff]  ;;  %s268_s21 = scalar_lea.vmem [#allocation10], %s590_s12  ;;  %s620_s26 = sshll.u32 %s959_s19, 6 }
  0x38   : > { %622 = vmatpush.msra.mxu3 %v282_v0  ;;  %v271_v4 = vld [vmem:[%s1065_s25] sm:$0xff]  ;;  %v272_v7 = vld [vmem:[%s1065_s25 + $0x8] sm:$0xff]  ;;  %v278_v9 = vld [vmem:[%s1065_s25 + $0x38] sm:$0xff]  ;;  %s473_s11 = scalar_lea.hbm %s1150_s4, %s620_s26  ;;  %s474_s13 = sshll.u32 %s268_s21, 4  ;;  %s475_s13 = int_to_ptr.vmem [resolvable:$true] %s474_s13 }
  0x39   : > { %321 = vmatpush.msra.mxu0 %v281_v1  ;;  %623 = vmatpush.msra.mxu2 %v281_v1  ;;  %v275_v5 = vld [vmem:[%s1065_s25 + $0x20] sm:$0xff]  ;;  %v276_v8 = vld [vmem:[%s1065_s25 + $0x28] sm:$0xff]  ;;  %v273_v10 = vld [vmem:[%s1065_s25 + $0x10] sm:$0xff]  ;;  %s476_s14 = sshll.u32 %s473_s11, 4  ;;  %s461_s19 = scalar_lea.sflag [#allocation4], %s1059_s30  ;;  %s477_s14 = int_to_ptr.hbm [resolvable:$true] %s476_s14 }
  0x3a   : > { %624 = vmatpush.msra.mxu3 %v281_v1  ;;  %v274_v11 = vld [vmem:[%s1065_s25 + $0x18] sm:$0xff]  ;;  %v349_v16 = vld [vmem:[#allocation7] sm:$0xff]  ;;  %v350_v20 = vld [vmem:[#allocation7 + $0x8] sm:$0xff]  ;;  %s844_s20 = sshra.s32 %s477_s14, 4  ;;  %s850_s9 = scalar_lea.hbm %s1150_s4, 128  ;;  %s845_s20 = int_to_ptr.hbm [resolvable:$true] %s844_s20 }
  0x3b   : > { %322 = vmatpush.msra.mxu0 %v280_v2  ;;  %625 = vmatpush.msra.mxu2 %v280_v2  ;;  %v351_v22 = vld [vmem:[#allocation8] sm:$0xff]  ;;  %v352_v25 = vld [vmem:[#allocation8 + $0x8] sm:$0xff]  ;;  %s846_s29 = scalar_lea.hbm %s845_s20, 64  ;;  %p851_p11 = scmp.lt.s32.totalorder %s845_s20, %s1150_s4 }
  0x3c   : > { %626 = vmatpush.msra.mxu3 %v280_v2  ;;  %p847_p1 = scmp.ne.s32.totalorder %s845_s20, %s846_s29  ;;  %p852_p9 = scmp.lt.s32.totalorder %s850_s9, %s846_s29 }
  0x3d   : > { %323 = vmatpush.msra.mxu0 %v279_v3  ;;  %627 = vmatpush.msra.mxu2 %v279_v3 }
  0x3e   : > { %595 = vmatmul.msk.f32.vlgmr.msra.gmra.mxu0 %vm283_vm0, %v271_v4  ;;  %599 = vmatmul.msk.f32.vlgmr.msra.gmra.mxu2 %vm283_vm0, %v275_v5  ;;  %p848_p4 = pnand %p847_p1, %p1029_p3  ;;  %p853_p2 = por %p852_p9, %p851_p11 }
  0x3f   : > { %628 = vmatpush.msra.mxu3 %v279_v3 }
  0x40   : > { %601 = vmatmul.msk.f32.vlgmr.msra.gmra.mxu3 %vm283_vm0, %v277_v6  ;;  %p849_p8 = pneg %p848_p4 }
  0x42   : > { %p854_p10 = pnand %p853_p2, %p849_p8 }
  0x46   : > { %596 = vmatmul.msk.f32.gmra.mxu0 %vm283_vm0, %v272_v7  ;;  %600 = vmatmul.msk.f32.gmra.mxu2 %vm283_vm0, %v276_v8 }
  0x48   : > { %602 = vmatmul.msk.f32.gmra.mxu3 %vm283_vm0, %v278_v9 }
  0x4e   : > { %597 = vmatmul.msk.f32.gmra.mxu0 %vm283_vm0, %v273_v10 }
  0x56   : > { %598 = vmatmul.msk.f32.gmra.mxu0 %vm283_vm0, %v274_v11 }
  0xbb   : > { %v325_v12 = vpop.f32.mrf.mxu0 }
  0xc1   : > { %v337_v13 = vpop.f32.mrf.mxu2 }
  0xc3   : > { %v328_v14 = vpop.f32.mrf.mxu0  ;;  %v343_v15 = vpop.f32.mrf.mxu3 }
  0xc4   : > { %374 = vmatpush.msra.mxu1 %v328_v14 }
  0xc6   : > { %375 = vmatpush.msra.mxu1 %v325_v12 }
  0xc7   : > { %603 = vmatmul.msk.f32.vlgmr.msra.gmra.mxu1 %vm353_vm1, %v349_v16 }
  0xc9   : > { %v340_v17 = vpop.f32.mrf.mxu2 }
  0xca   : > { %420 = vmatpush.msrb.mxu3 %v340_v17 }
  0xcb   : > { %v331_v18 = vpop.f32.mrf.mxu0  ;;  %v346_v19 = vpop.f32.mrf.mxu3 }
  0xcc   : > { %421 = vmatpush.msrb.mxu3 %v337_v13  ;;  %443 = vmatpush.msrb.mxu1 %v346_v19 }
  0xcd   : > { %607 = vmatmul.msk.f32.vlgmr.msrb.gmra.mxu3 %vm353_vm1, %v349_v16 }
  0xce   : > { %444 = vmatpush.msrb.mxu1 %v343_v15 }
  0xcf   : > { %604 = vmatmul.msk.f32.gmra.mxu1 %vm353_vm1, %v350_v20 }
  0xd3   : > { %v334_v21 = vpop.f32.mrf.mxu0 }
  0xd4   : > { %397 = vmatpush.msrb.mxu2 %v334_v21 }
  0xd5   : > { %608 = vmatmul.msk.f32.gmra.mxu3 %vm353_vm1, %v350_v20 }
  0xd6   : > { %398 = vmatpush.msrb.mxu2 %v331_v18 }
  0xd7   : > { %605 = vmatmul.msk.f32.vlgmr.msrb.gmra.mxu2 %vm353_vm1, %v349_v16  ;;  %609 = vmatmul.msk.f32.vlgmr.msrb.gmra.mxu1 %vm353_vm1, %v349_v16 }
  0xdf   : > { %606 = vmatmul.msk.f32.gmra.mxu2 %vm353_vm1, %v350_v20  ;;  %610 = vmatmul.msk.f32.gmra.mxu1 %vm353_vm1, %v350_v20 }
 0x144   : > { %v377_v23 = vpop.f32.mrf.mxu1 }
 0x145   : > { %v378_v24 = vadd.f32 %v377_v23, %v351_v22 }
 0x147   : > { %452 = vst.msk [vmem:[%s268_s21] sm:$0xff] %vm283_vm0, %v378_v24 }
 0x14c   : > { %v380_v26 = vpop.f32.mrf.mxu1 }
 0x14d   : > { %v381_v27 = vadd.f32 %v380_v26, %v352_v25 }
 0x14f   : > { %453 = vst.msk [vmem:[%s268_s21 + $0x8] sm:$0xff] %vm283_vm0, %v381_v27 }
 0x150   : > { %v423_v28 = vpop.f32.mrf.mxu3 }
 0x151   : > { %v424_v29 = vadd.f32 %v423_v28, %v351_v22 }
 0x153   : > { %456 = vst.msk [vmem:[%s268_s21 + $0x20] sm:$0xff] %vm283_vm0, %v424_v29 }
 0x154   : > { %v446_v30 = vpop.f32.mrf.mxu1 }
 0x155   : > { %v447_v31 = vadd.f32 %v446_v30, %v351_v22 }
 0x157   : > { %458 = vst.msk [vmem:[%s268_s21 + $0x30] sm:$0xff] %vm283_vm0, %v447_v31 }
 0x158   : > { %v426_v32 = vpop.f32.mrf.mxu3 }
 0x159   : > { %v427_v33 = vadd.f32 %v426_v32, %v352_v25 }
 0x15a   : > { %v400_v34 = vpop.f32.mrf.mxu2 }
 0x15b   : > { %v401_v35 = vadd.f32 %v400_v34, %v351_v22  ;;  %457 = vst.msk [vmem:[%s268_s21 + $0x28] sm:$0xff] %vm283_vm0, %v427_v33 }
 0x15c   : > { %v449_v36 = vpop.f32.mrf.mxu1 }
 0x15d   : > { %454 = vst.msk [vmem:[%s268_s21 + $0x10] sm:$0xff] %vm283_vm0, %v401_v35  ;;  %v450_v37 = vadd.f32 %v449_v36, %v352_v25 }
 0x15f   : > { %459 = vst.msk [vmem:[%s268_s21 + $0x38] sm:$0xff] %vm283_vm0, %v450_v37 }
 0x162   : > { %v403_v38 = vpop.f32.mrf.mxu2 }
 0x163   : > { %v404_v39 = vadd.f32 %v403_v38, %v352_v25 }
 0x165   : > { %455 = vst.msk [vmem:[%s268_s21 + $0x18] sm:$0xff] %vm283_vm0, %v404_v39 }
 0x166   : > { %857 = shalt.err (!%p854_p10)
}
 0x167   : > { %s911_s30 = smov 128   ;;  %s912_s24 = smov 8  }
 0x168   : > { %643 = dma.vmem_to_hbm [thread:$0]  (%p1029_p3), %s475_s13, 1024, %s477_s14, %s461_s19, %s911_s30, %s911_s30, %s912_s24  }
 0x169 PF: > { %s491_s25 = sand.u32 1, %s892_s15   ;;  %p1157_p12 = scmp.ge.s32.totalorder %s904_s18, 2 }
 0x16a   : > { %s492_s21 = scalar_lea.sflag [#allocation4], %s491_s25 }
 0x16b   : > { %p660_p13 = pnand %p1157_p12, %p973_p6 }
 0x16d   : > { %p661_p0 = pneg %p660_p13 }
 0x16f   : > { %887 = dma.done.wait (%p661_p0), %s492_s21, 1024  }
 0x170   : > { %889 = vsyncadd (%p661_p0), %s492_s21, 4294966272  ;;  %p19_p5 = scmp.ge.s32.totalorder %s1011_s23, 4   ;;  %s1158_s15 = smov %s896_s16 }
 0x171   : > { %s1159_s16 = smov %s900_s17  ;;  %s1160_s17 = smov %s1025_s27 }
 0x172   : > { %s1161_s18 = smov %s1011_s23  ;;  %21 = sbr.rel (!%p19_p5) target bundleno = 7 (0x7), region = 93 }
 0x177   :  { %498 = vsyncpa [#allocation3], 1 }
 0x178   :  { %500 = vsyncpa [#allocation3 + $0x1], 1 }
 0x179   :  { %501 = vsyncpa [#allocation6], 1 }
 0x17a   :  { %502 = vsyncpa [#allocation9], 1 }
 0x17b   :  { %503 = vsyncpa [#allocation4], 1 }
 0x17c   :  { %505 = vsyncpa [#allocation4 + $0x1], 1 }

</bundles_post_ra>
